<compile_context>
chip_gen: v7x
topology: tpu7x:2x2x1
jax: 0.10.0
libtpu: 0.0.40
codegen_flags: <defaults>
</compile_context>

<pallas_src>
import jax
import jax.numpy as jnp
from jax.experimental import pallas as pl
from jax.experimental.pallas import tpu as pltpu

NUM_DIR = 8
INPUT_SIZE = NUM_DIR          # 8
HIDDEN_SIZE = INPUT_SIZE * 2  # 16
OUTPUT_SIZE = NUM_DIR         # 8


def _round_up(x, m):
    return ((x + m - 1) // m) * m


def dqn_kernel(x_ref, w1_ref, b1_ref, w2_ref, b2_ref, out_ref):
    # x_ref:  [INPUT_SIZE, TB]   (batch on lanes -> fully lane-dense)
    # w1_ref: [HIDDEN_SIZE, INPUT_SIZE]   b1_ref: [HIDDEN_SIZE, 1]
    # w2_ref: [OUTPUT_SIZE, HIDDEN_SIZE]  b2_ref: [OUTPUT_SIZE, 1]
    # out_ref:[OUTPUT_SIZE, TB]
    x = x_ref[...]
    # fc1 + ReLU: MXU matmul with N = TB (>=128 lanes), bias/relu on the VPU.
    h = jnp.dot(w1_ref[...], x, preferred_element_type=jnp.float32) + b1_ref[...]
    h = jnp.maximum(h, 0.0)
    # fc2
    y = jnp.dot(w2_ref[...], h, preferred_element_type=jnp.float32) + b2_ref[...]
    out_ref[...] = y.astype(out_ref.dtype)


def dqn_forward(x, w1, b1, w2, b2, *, batch_tile=2048):
    """x: [B, INPUT_SIZE] f32.
    w1: [HIDDEN_SIZE, INPUT_SIZE], b1: [HIDDEN_SIZE, 1],
    w2: [OUTPUT_SIZE, HIDDEN_SIZE], b2: [OUTPUT_SIZE, 1] (PyTorch layouts).
    Returns [B, OUTPUT_SIZE].
    """
    B = x.shape[0]
    # Batch tile: multiple of 128 (lane width); don't exceed what the batch needs.
    batch_tile = _round_up(batch_tile, 128)
    TB = min(batch_tile, _round_up(B, 128))
    B_pad = _round_up(B, TB)

    # Layout plumbing in the wrapper: batch -> lane axis, pad ragged tail with zeros.
    # (Lane-dense kernel I/O is worth this; it's layout plumbing, not compute.)
    x_t = jnp.pad(x.T, ((0, 0), (0, B_pad - B)))          # [INPUT_SIZE, B_pad]

    grid = (B_pad // TB,)

    out_t = pl.pallas_call(
        dqn_kernel,
        out_shape=jax.ShapeDtypeStruct((OUTPUT_SIZE, B_pad), x.dtype),
        grid=grid,
        in_specs=[
            # Streamed batch blocks (double-buffered by Pallas).
            pl.BlockSpec((INPUT_SIZE, TB), lambda i: (0, i)),
            # Weights / biases: constant block index -> fetched once, resident in VMEM.
            pl.BlockSpec((HIDDEN_SIZE, INPUT_SIZE), lambda i: (0, 0)),
            pl.BlockSpec((HIDDEN_SIZE, 1), lambda i: (0, 0)),
            pl.BlockSpec((OUTPUT_SIZE, HIDDEN_SIZE), lambda i: (0, 0)),
            pl.BlockSpec((OUTPUT_SIZE, 1), lambda i: (0, 0)),
        ],
        out_specs=pl.BlockSpec((OUTPUT_SIZE, TB), lambda i: (0, i)),
        compiler_params=pltpu.CompilerParams(
            dimension_semantics=("parallel",),   # lets v7x shard blocks over 2 TCs
        ),
    )(x_t, w1, b1, w2, b2)

    return out_t[:, :B].T                                  # back to [B, OUTPUT_SIZE]


def init_params(key):
    """Deterministic init mirroring nn.Linear's default U(-1/sqrt(fan_in), 1/sqrt(fan_in)).

    Weights are stored in PyTorch layout [out_features, in_features];
    biases as [out_features, 1] (broadcast over the lane/batch axis in-kernel).
    """
    k1, k2, k3, k4 = jax.random.split(key, 4)
    bound1 = 1.0 / jnp.sqrt(jnp.float32(INPUT_SIZE))
    bound2 = 1.0 / jnp.sqrt(jnp.float32(HIDDEN_SIZE))
    w1 = jax.random.uniform(k1, (HIDDEN_SIZE, INPUT_SIZE), jnp.float32, -bound1, bound1)
    b1 = jax.random.uniform(k2, (HIDDEN_SIZE, 1), jnp.float32, -bound1, bound1)
    w2 = jax.random.uniform(k3, (OUTPUT_SIZE, HIDDEN_SIZE), jnp.float32, -bound2, bound2)
    b2 = jax.random.uniform(k4, (OUTPUT_SIZE, 1), jnp.float32, -bound2, bound2)
    return w1, b1, w2, b2


def dqn_reference(x, w1, b1, w2, b2):
    h = jnp.maximum(x @ w1.T + b1.T, 0.0)
    return h @ w2.T + b2.T


if __name__ == "__main__":
    key = jax.random.PRNGKey(0)
    k_x, k_p, k_x2 = jax.random.split(key, 3)
    w1, b1, w2, b2 = init_params(k_p)

    # Small case consistent with the module (batch=2, 8 features).
    B = 2
    x = jax.random.normal(k_x, (B, INPUT_SIZE), jnp.float32)
    out = dqn_forward(x, w1, b1, w2, b2)
    jax.block_until_ready(out)
    ref = dqn_reference(x, w1, b1, w2, b2)
    assert out.shape == (B, OUTPUT_SIZE)
    assert jnp.allclose(out, ref, atol=1e-5, rtol=1e-5), "mismatch vs reference (B=2)"

    # Larger, ragged batch: exercises multi-block grid + tail padding/slicing.
    B2 = 5000
    x2 = jax.random.normal(k_x2, (B2, INPUT_SIZE), jnp.float32)
    out2 = dqn_forward(x2, w1, b1, w2, b2, batch_tile=1024)
    jax.block_until_ready(out2)
    ref2 = dqn_reference(x2, w1, b1, w2, b2)
    assert out2.shape == (B2, OUTPUT_SIZE)
    assert jnp.allclose(out2, ref2, atol=1e-5, rtol=1e-5), "mismatch vs reference (B=5000)"

    print("KERNEL_OK")
</pallas_src>

<mosaic_0001>
module attributes {stable_mosaic.version = 11 : i64} {
  func.func @dqn_kernel(%arg0: i32, %arg1: memref<8x128xf32, #tpu.memory_space<vmem>>, %arg2: memref<16x8xf32, #tpu.memory_space<vmem>>, %arg3: memref<16x1xf32, #tpu.memory_space<vmem>>, %arg4: memref<8x16xf32, #tpu.memory_space<vmem>>, %arg5: memref<8x1xf32, #tpu.memory_space<vmem>>, %arg6: memref<8x128xf32, #tpu.memory_space<vmem>>) attributes {dimension_semantics = [#tpu.dimension_semantics<parallel>], iteration_bounds = array<i64: 1>, scalar_prefetch = 0 : i64, scratch_operands = 0 : i64, tpu.core_type = #tpu.core_type<tc>, window_params = [{transform_indices = @transform_0, window_bounds = array<i64: 8, 128>}, {pipeline_mode = #tpu.pipeline_mode<synchronous>, transform_indices = @transform_1, window_bounds = array<i64: 16, 8>}, {pipeline_mode = #tpu.pipeline_mode<synchronous>, transform_indices = @transform_2, window_bounds = array<i64: 16, 1>}, {pipeline_mode = #tpu.pipeline_mode<synchronous>, transform_indices = @transform_3, window_bounds = array<i64: 8, 16>}, {pipeline_mode = #tpu.pipeline_mode<synchronous>, transform_indices = @transform_4, window_bounds = array<i64: 8, 1>}, {transform_indices = @transform_5, window_bounds = array<i64: 8, 128>}]} {
    %c0 = arith.constant 0 : index
    %c0_0 = arith.constant 0 : index
    %0 = vector.load %arg1[%c0, %c0_0] : memref<8x128xf32, #tpu.memory_space<vmem>>, vector<8x128xf32>
    %c0_1 = arith.constant 0 : index
    %c0_2 = arith.constant 0 : index
    %1 = vector.load %arg2[%c0_1, %c0_2] : memref<16x8xf32, #tpu.memory_space<vmem>>, vector<16x8xf32>
    %cst = arith.constant dense<0.000000e+00> : vector<16x128xf32>
    %2 = tpu.matmul %1, %0, %cst {dimension_numbers = #tpu.dot_dimension_numbers<[1], [0], [0], [1], [0, 0, 1, 1], [], []>} : vector<16x8xf32>, vector<8x128xf32>, vector<16x128xf32> -> vector<16x128xf32>
    %c0_3 = arith.constant 0 : index
    %c0_4 = arith.constant 0 : index
    %3 = vector.load %arg3[%c0_3, %c0_4] : memref<16x1xf32, #tpu.memory_space<vmem>>, vector<16x1xf32>
    %4 = vector.broadcast %3 : vector<16x1xf32> to vector<16x128xf32>
    %5 = arith.addf %2, %4 : vector<16x128xf32>
    %cst_5 = arith.constant 0.000000e+00 : f32
    %6 = vector.broadcast %cst_5 : f32 to vector<16x128xf32>
    %7 = arith.maximumf %5, %6 : vector<16x128xf32>
    %c0_6 = arith.constant 0 : index
    %c0_7 = arith.constant 0 : index
    %8 = vector.load %arg4[%c0_6, %c0_7] : memref<8x16xf32, #tpu.memory_space<vmem>>, vector<8x16xf32>
    %cst_8 = arith.constant dense<0.000000e+00> : vector<8x128xf32>
    %9 = tpu.matmul %8, %7, %cst_8 {dimension_numbers = #tpu.dot_dimension_numbers<[1], [0], [0], [1], [0, 0, 1, 1], [], []>} : vector<8x16xf32>, vector<16x128xf32>, vector<8x128xf32> -> vector<8x128xf32>
    %c0_9 = arith.constant 0 : index
    %c0_10 = arith.constant 0 : index
    %10 = vector.load %arg5[%c0_9, %c0_10] : memref<8x1xf32, #tpu.memory_space<vmem>>, vector<8x1xf32>
    %11 = vector.broadcast %10 : vector<8x1xf32> to vector<8x128xf32>
    %12 = arith.addf %9, %11 : vector<8x128xf32>
    %c0_11 = arith.constant 0 : index
    %c0_12 = arith.constant 0 : index
    %13 = vector.load %arg6[%c0_11, %c0_12] : memref<8x128xf32, #tpu.memory_space<vmem>>, vector<8x128xf32>
    tpu.vector_store %arg6[%c0_11, %c0_12], %12 {strides = array<i32>} : memref<8x128xf32, #tpu.memory_space<vmem>>, vector<8x128xf32>,
    return
  }
  func.func @transform_0(%arg0: i32) -> (i32, i32) {
    %c0_i32 = arith.constant 0 : i32
    %c0_i32_0 = arith.constant 0 : i32
    return %c0_i32, %arg0 : i32, i32
  }
  func.func @transform_1(%arg0: i32) -> (i32, i32) {
    %c0_i32 = arith.constant 0 : i32
    %c0_i32_0 = arith.constant 0 : i32
    %c0_i32_1 = arith.constant 0 : i32
    return %c0_i32, %c0_i32_0 : i32, i32
  }
  func.func @transform_2(%arg0: i32) -> (i32, i32) {
    %c0_i32 = arith.constant 0 : i32
    %c0_i32_0 = arith.constant 0 : i32
    %c0_i32_1 = arith.constant 0 : i32
    return %c0_i32, %c0_i32_0 : i32, i32
  }
  func.func @transform_3(%arg0: i32) -> (i32, i32) {
    %c0_i32 = arith.constant 0 : i32
    %c0_i32_0 = arith.constant 0 : i32
    %c0_i32_1 = arith.constant 0 : i32
    return %c0_i32, %c0_i32_0 : i32, i32
  }
  func.func @transform_4(%arg0: i32) -> (i32, i32) {
    %c0_i32 = arith.constant 0 : i32
    %c0_i32_0 = arith.constant 0 : i32
    %c0_i32_1 = arith.constant 0 : i32
    return %c0_i32, %c0_i32_0 : i32, i32
  }
  func.func @transform_5(%arg0: i32) -> (i32, i32) {
    %c0_i32 = arith.constant 0 : i32
    %c0_i32_0 = arith.constant 0 : i32
    return %c0_i32, %arg0 : i32, i32
  }
}

</mosaic_0001>

<bundles_post_ra>
// kernel: tpu_custom_call.1
= control target key start
LH: loop header
LB: loop body
LE: loop exit
PB: predicated region body
PF: predicated region fallthrough
CT: control target
= control target key end

     0   :  { %vm36_vm0 = vcmask 64512   ;;  %s339_s0 = inlined_call_operand.vmem [shape: f32[8,128], index: 0, kind: input, shape index: {}]   ;;  %s340_s1 = inlined_call_operand.vmem [shape: f32[16,8], index: 1, kind: input, shape index: {}]   ;;  %s341_s2 = inlined_call_operand.vmem [shape: f32[16,1], index: 2, kind: input, shape index: {}]   ;;  %s342_s3 = inlined_call_operand.vmem [shape: f32[8,16], index: 3, kind: input, shape index: {}]   ;;  %s343_s4 = inlined_call_operand.vmem [shape: f32[8,1], index: 4, kind: input, shape index: {}]   ;;  %s344_s5 = inlined_call_operand.hbm [shape: f32[8,128], index: 5, kind: output, shape index: {}]  }
   0x1   :  { %v21_v0 = vld [vmem:[%s339_s0] sm:$0xff]  ;;  %v23_v2 = vld [vmem:[%s340_s1 + $0x8] sm:$0xff] }
   0x2   :  { %v22_v1 = vld [vmem:[%s340_s1] sm:$0xff]  ;;  %225 = vmatprep.subr.mxu0 %v21_v0 }
   0x3   :  { %227 = vmatprep.mubr.msk.f32.mxu0 %vm36_vm0, %v22_v1  ;;  %v24_v3 = vld [vmem:[%s341_s2] sm:$0xff] }
   0x4   :  { %10 = vsyncpa [#allocation3], 0  ;;  %226 = vmatpush3.msra.mxu0 %v21_v0  ;;  %v271_v4 = vmov 0   ;;  %v25_v5 = vld [vmem:[%s341_s2 + $0x8] sm:$0xff]  ;;  %v272_v6 = vmov 0.0|0.0   ;;  %vm273_vm1 = vmmov 0  }
   0x5   :  { %245 = vset.pattern.permute.xlu0 %v271_v4  ;;  %228 = vmatmul.mubr.msk.f32.vlgmr.msra.gmra.mrb[0].mxu0 %vm36_vm0, %v23_v2  ;;  %v274_v7 = vmov 0.0   ;;  %v121_v8 = vld [vmem:[%s343_s4] sm:$0xff]  ;;  %vm127_vm2 = vcmask 130048   ;;  %s275_s29 = smov [#allocation2]  }
   0x6   :  { %28 = vperm.xlu0 %245, %v24_v3   ;;  %246 = vset.pattern.permute.xlu1 %v271_v4  ;;  %v120_v18 = vld [vmem:[%s342_s3] sm:$0xff]  ;;  %s208_s4 = sshll.u32 %s275_s29, 4  ;;  %s209_s4 = int_to_ptr.vmem [resolvable:$true] %s208_s4 }
   0x7   :  { %237 = vmatprep.subr.bf16.mxu1 %v272_v6  ;;  %234 = vmatprep.mubr.msk.f32.mxu1 %vm273_vm1, %v274_v7  ;;  %s247_s30 = scalar_lea.vmem %s209_s4, 128  ;;  %p252_p1 = scmp.lt.s32.totalorder %s209_s4, %s209_s4 }
   0x8   :  { %124 = vperm.xlu1 %246, %v121_v8   ;;  %p248_p0 = scmp.ne.s32.totalorder %s209_s4, %s247_s30  ;;  %p253_p2 = scmp.lt.s32.totalorder %s247_s30, %s247_s30 }
   0xa   :  { %33 = vperm.xlu0 %245, %v25_v5   ;;  %p254_p3 = por %p253_p2, %p252_p1 }
   0xc   :  { %p255_p4 = pnand %p254_p3, %p248_p0 }
  0x85   :  { %v29_v9 = vpop.permute.xlu0 %28 }
  0x87   :  { %v125_v19 = vpop.permute.xlu1 %124 }
  0x89   :  { %v34_v10 = vpop.permute.xlu0 %33 }
  0xd8   :  { %v229_v11 = vpop.f32.mrb[0].mxu0 }
  0xd9   :  { %v115_v12 = vadd.f32 %v229_v11, %v34_v10  ;;  %v109_v13 = vpop.f32.mrb[1].mxu0 }
  0xda   :  { %v110_v14 = vadd.f32 %v109_v13, %v29_v9 }
  0xdb   :  { %v119_v15 = vmax.f32 %v115_v12, 0.0 }
  0xdc   :  { %v118_v16 = vmax.f32 %v110_v14, 0.0 }
  0xde   :  { %v238_v17 = vpack.c.bf16 %v119_v15, %v118_v16 }
  0xe0   :  { %239 = vmatpush3.bf16.msra.mxu1 %v238_v17 }
  0xe3   :  { %235 = vmatmul.mubr.msk.f32.vlgmr.msra.gmra.mrb[0].mxu1 %vm127_vm2, %v120_v18 }
 0x1b6   :  { %v197_v20 = vpop.f32.mrb[0].mxu1 }
 0x1b7   :  { %v198_v21 = vadd.f32 %v197_v20, %v125_v19  ;;  %v236_v22 = vpop.f32.mrb[1].mxu1 }
 0x1b9   :  { %201 = vst [vmem:[#allocation2] sm:$0xff] %v198_v21 }
 0x1ba   :  { %258 = shalt.err (!%p255_p4)
}
 0x1bb   :  { %s259_s3 = scalar_lea.hbm %s344_s5, 128 }
 0x1bc   :  { %p260_p5 = scmp.ne.s32.totalorder %s344_s5, %s259_s3  ;;  %p263_p6 = scmp.lt.u32.totalorder %s259_s3, %s344_s5 }
 0x1be   :  { %p265_p7 = pnand %p263_p6, %p260_p5 }
 0x1c0   :  { %268 = shalt.err (!%p265_p7)
}
 0x1c1   :  { %211 = dma.vmem_to_hbm [thread:$0]  %s209_s4, 128, %s344_s5, [#allocation3]  }
 0x1c2   :  { %269 = dma.done.wait [#allocation3], 128  }
 0x1c3   :  { %270 = vsyncadd [#allocation3], 4294967168 }
 0x1c4   :  { %215 = vsyncpa [#allocation3], 1 }

</bundles_post_ra>
